<compile_context>
chip_gen: v6e
topology: v6e:2x2x1
jax: 0.10.0
libtpu: 0.0.40
codegen_flags: <defaults>
</compile_context>

<pallas_src>
import functools

import jax
import jax.numpy as jnp
from jax.experimental import pallas as pl
from jax.experimental.pallas import tpu as pltpu

IN_FEATURES = 22
HIDDEN = 256
NUM_OUTPUTS = 14


@functools.lru_cache(maxsize=1)
def _chip_budget():
    """Return (max_batch_tile, vmem_limit_bytes) from the chip's VMEM size."""
    try:
        info = pltpu.get_tpu_info()
        vmem = getattr(info, "vmem_capacity_bytes", 64 << 20)
    except Exception:
        vmem = 64 << 20  # conservative (v7x-sized) fallback
    if vmem >= (100 << 20):          # v5e / v6e: 128 MiB VMEM per core
        return 16384, 96 << 20       # ~3 KB VMEM/row -> ~48-56 MiB footprint
    return 8192, 48 << 20            # v7x: 64 MiB per TensorCore -> keep headroom


def _pick_tb(batch, tb_cap):
    """Batch tile: big enough to amortize grid-step overhead, small enough for
    VMEM, and giving >=4 grid steps for mid-size batches (v7x megacore)."""
    if batch <= 256:
        return batch                 # single tile; block dim == array dim is legal
    tb = min(tb_cap, max(256, pl.cdiv(batch, 4)))
    tb = ((tb + 7) // 8) * 8         # second-minor block dim must be a multiple of 8
    return min(tb, tb_cap)


def mlp_kernel(x_ref, w1_ref, b1_ref, w2_ref, b2_ref, o_ref):
    x = x_ref[...]                                              # (TB, 22) f32
    h = jnp.dot(x, w1_ref[...],
                preferred_element_type=jnp.float32)             # (TB, 256)  MXU
    h = jnp.maximum(h + b1_ref[...], 0.0)                       # bias + ReLU (VPU)
    # Dropout(p=0.5): identity in eval mode.
    # TODO(synk): training-mode dropout (pltpu.prng_seed/prng_random_bits +
    # 1/(1-p) scaling) not implemented; eval semantics used.
    h = h.astype(jnp.bfloat16)                                  # halve h traffic
    out = jnp.dot(h, w2_ref[...].astype(jnp.bfloat16),
                  preferred_element_type=jnp.float32)           # (TB, 14)  MXU, f32 acc
    o_ref[...] = (out + b2_ref[...]).astype(o_ref.dtype)        # direct 14-wide store


@functools.partial(jax.jit, static_argnames=("tb", "vmem_limit"))
def _mlp_pallas(x, w1, b1, w2, b2, *, tb, vmem_limit):
    B = x.shape[0]
    grid = (pl.cdiv(B, tb),)

    weight_bytes = (w1.size + b1.size + w2.size + b2.size) * 4
    cost = pl.CostEstimate(
        flops=2 * B * (IN_FEATURES * HIDDEN + HIDDEN * NUM_OUTPUTS),
        bytes_accessed=B * (IN_FEATURES + NUM_OUTPUTS) * 4 + weight_bytes,
        transcendentals=0,
    )

    return pl.pallas_call(
        mlp_kernel,
        out_shape=jax.ShapeDtypeStruct((B, NUM_OUTPUTS), jnp.float32),
        grid_spec=pltpu.PrefetchScalarGridSpec(
            num_scalar_prefetch=0,
            grid=grid,
            in_specs=[
                pl.BlockSpec((tb, IN_FEATURES), lambda i: (i, 0)),     # streamed x tile
                pl.BlockSpec((IN_FEATURES, HIDDEN), lambda i: (0, 0)),  # resident W1
                pl.BlockSpec((1, HIDDEN), lambda i: (0, 0)),            # resident b1
                pl.BlockSpec((HIDDEN, NUM_OUTPUTS), lambda i: (0, 0)),  # resident W2
                pl.BlockSpec((1, NUM_OUTPUTS), lambda i: (0, 0)),       # resident b2
            ],
            out_specs=pl.BlockSpec((tb, NUM_OUTPUTS), lambda i: (i, 0)),
        ),
        compiler_params=pltpu.CompilerParams(
            dimension_semantics=("parallel",),   # shard batch tiles across TCs on v7x
            vmem_limit_bytes=vmem_limit,
        ),
        cost_estimate=cost,
    )(x, w1, b1, w2, b2)


def mlp_forward(x, w1, b1, w2, b2):
    tb_cap, vmem_limit = _chip_budget()
    tb = _pick_tb(x.shape[0], tb_cap)
    out = _mlp_pallas(x, w1, b1, w2, b2, tb=tb, vmem_limit=vmem_limit)
    # Match PyTorch `out.squeeze()` semantics (drops ALL size-1 dims;
    # e.g. batch==1 -> shape (14,)).
    return jnp.squeeze(out)


def init_params(key):
    # Match nn.Linear default init: U(-1/sqrt(fan_in), 1/sqrt(fan_in)) for W and b.
    k1, k2, k3, k4 = jax.random.split(key, 4)
    bound1 = 1.0 / jnp.sqrt(IN_FEATURES)
    bound2 = 1.0 / jnp.sqrt(HIDDEN)
    w1 = jax.random.uniform(k1, (IN_FEATURES, HIDDEN), jnp.float32, -bound1, bound1)
    b1 = jax.random.uniform(k2, (1, HIDDEN), jnp.float32, -bound1, bound1)
    w2 = jax.random.uniform(k3, (HIDDEN, NUM_OUTPUTS), jnp.float32, -bound2, bound2)
    b2 = jax.random.uniform(k4, (1, NUM_OUTPUTS), jnp.float32, -bound2, bound2)
    return w1, b1, w2, b2


if __name__ == "__main__":
    key = jax.random.PRNGKey(0)
    k_in, k_params = jax.random.split(key)

    w1, b1, w2, b2 = init_params(k_params)

    def ref_fn(x):
        # eval-mode dropout == identity
        return jnp.squeeze(jnp.maximum(x @ w1 + b1, 0.0) @ w2 + b2)

    # Small shape consistent with the module (batch=2, 22 features).
    B = 2
    x_small = jax.random.normal(k_in, (B, IN_FEATURES), jnp.float32)
    out_small = jax.block_until_ready(mlp_forward(x_small, w1, b1, w2, b2))
    assert out_small.shape == (B, NUM_OUTPUTS)
    # bf16 second matmul (f32 accumulation) -> loose-ish tolerance.
    assert jnp.allclose(out_small, ref_fn(x_small), atol=1e-2, rtol=1e-2)

    # Modest batch exercising the tiled grid (multiple steps + partial edge tile).
    B2 = 1032
    x_big = jax.random.normal(k_in, (B2, IN_FEATURES), jnp.float32)
    out_big = jax.block_until_ready(mlp_forward(x_big, w1, b1, w2, b2))
    assert out_big.shape == (B2, NUM_OUTPUTS)
    assert jnp.allclose(out_big, ref_fn(x_big), atol=1e-2, rtol=1e-2)

    print("KERNEL_OK")
</pallas_src>

<mosaic_0001>
module attributes {stable_mosaic.version = 11 : i64} {
  func.func @mlp_kernel(%arg0: i32, %arg1: memref<2x22xf32, #tpu.memory_space<vmem>>, %arg2: memref<22x256xf32, #tpu.memory_space<vmem>>, %arg3: memref<1x256xf32, #tpu.memory_space<vmem>>, %arg4: memref<256x14xf32, #tpu.memory_space<vmem>>, %arg5: memref<1x14xf32, #tpu.memory_space<vmem>>, %arg6: memref<2x14xf32, #tpu.memory_space<vmem>>) attributes {dimension_semantics = [#tpu.dimension_semantics<parallel>], iteration_bounds = array<i64: 1>, scalar_prefetch = 0 : i64, scratch_operands = 0 : i64, tpu.core_type = #tpu.core_type<tc>, window_params = [{transform_indices = @transform_0, window_bounds = array<i64: 2, 22>}, {pipeline_mode = #tpu.pipeline_mode<synchronous>, transform_indices = @transform_1, window_bounds = array<i64: 22, 256>}, {pipeline_mode = #tpu.pipeline_mode<synchronous>, transform_indices = @transform_2, window_bounds = array<i64: 1, 256>}, {pipeline_mode = #tpu.pipeline_mode<synchronous>, transform_indices = @transform_3, window_bounds = array<i64: 256, 14>}, {pipeline_mode = #tpu.pipeline_mode<synchronous>, transform_indices = @transform_4, window_bounds = array<i64: 1, 14>}, {transform_indices = @transform_5, window_bounds = array<i64: 2, 14>}]} {
    %c0 = arith.constant 0 : index
    %c0_0 = arith.constant 0 : index
    %0 = vector.load %arg1[%c0, %c0_0] : memref<2x22xf32, #tpu.memory_space<vmem>>, vector<2x22xf32>
    %c0_1 = arith.constant 0 : index
    %c0_2 = arith.constant 0 : index
    %1 = vector.load %arg2[%c0_1, %c0_2] : memref<22x256xf32, #tpu.memory_space<vmem>>, vector<22x256xf32>
    %cst = arith.constant dense<0.000000e+00> : vector<2x256xf32>
    %2 = tpu.matmul %0, %1, %cst {dimension_numbers = #tpu.dot_dimension_numbers<[1], [0], [0], [1], [0, 0, 1, 1], [], []>} : vector<2x22xf32>, vector<22x256xf32>, vector<2x256xf32> -> vector<2x256xf32>
    %c0_3 = arith.constant 0 : index
    %c0_4 = arith.constant 0 : index
    %3 = vector.load %arg3[%c0_3, %c0_4] : memref<1x256xf32, #tpu.memory_space<vmem>>, vector<1x256xf32>
    %4 = vector.broadcast %3 : vector<1x256xf32> to vector<2x256xf32>
    %5 = arith.addf %2, %4 : vector<2x256xf32>
    %cst_5 = arith.constant 0.000000e+00 : f32
    %6 = vector.broadcast %cst_5 : f32 to vector<2x256xf32>
    %7 = arith.maximumf %5, %6 : vector<2x256xf32>
    %8 = arith.truncf %7 : vector<2x256xf32> to vector<2x256xbf16>
    %c0_6 = arith.constant 0 : index
    %c0_7 = arith.constant 0 : index
    %9 = vector.load %arg4[%c0_6, %c0_7] : memref<256x14xf32, #tpu.memory_space<vmem>>, vector<256x14xf32>
    %10 = arith.truncf %9 : vector<256x14xf32> to vector<256x14xbf16>
    %cst_8 = arith.constant dense<0.000000e+00> : vector<2x14xf32>
    %11 = tpu.matmul %8, %10, %cst_8 {dimension_numbers = #tpu.dot_dimension_numbers<[1], [0], [0], [1], [0, 0, 1, 1], [], []>} : vector<2x256xbf16>, vector<256x14xbf16>, vector<2x14xf32> -> vector<2x14xf32>
    %c0_9 = arith.constant 0 : index
    %c0_10 = arith.constant 0 : index
    %12 = vector.load %arg5[%c0_9, %c0_10] : memref<1x14xf32, #tpu.memory_space<vmem>>, vector<1x14xf32>
    %13 = vector.broadcast %12 : vector<1x14xf32> to vector<2x14xf32>
    %14 = arith.addf %11, %13 : vector<2x14xf32>
    %c0_11 = arith.constant 0 : index
    %c0_12 = arith.constant 0 : index
    %15 = vector.load %arg6[%c0_11, %c0_12] : memref<2x14xf32, #tpu.memory_space<vmem>>, vector<2x14xf32>
    tpu.vector_store %arg6[%c0_11, %c0_12], %14 {strides = array<i32>} : memref<2x14xf32, #tpu.memory_space<vmem>>, vector<2x14xf32>,
    return
  }
  func.func @transform_0(%arg0: i32) -> (i32, i32) {
    %c0_i32 = arith.constant 0 : i32
    %c0_i32_0 = arith.constant 0 : i32
    return %arg0, %c0_i32 : i32, i32
  }
  func.func @transform_1(%arg0: i32) -> (i32, i32) {
    %c0_i32 = arith.constant 0 : i32
    %c0_i32_0 = arith.constant 0 : i32
    %c0_i32_1 = arith.constant 0 : i32
    return %c0_i32, %c0_i32_0 : i32, i32
  }
  func.func @transform_2(%arg0: i32) -> (i32, i32) {
    %c0_i32 = arith.constant 0 : i32
    %c0_i32_0 = arith.constant 0 : i32
    %c0_i32_1 = arith.constant 0 : i32
    return %c0_i32, %c0_i32_0 : i32, i32
  }
  func.func @transform_3(%arg0: i32) -> (i32, i32) {
    %c0_i32 = arith.constant 0 : i32
    %c0_i32_0 = arith.constant 0 : i32
    %c0_i32_1 = arith.constant 0 : i32
    return %c0_i32, %c0_i32_0 : i32, i32
  }
  func.func @transform_4(%arg0: i32) -> (i32, i32) {
    %c0_i32 = arith.constant 0 : i32
    %c0_i32_0 = arith.constant 0 : i32
    %c0_i32_1 = arith.constant 0 : i32
    return %c0_i32, %c0_i32_0 : i32, i32
  }
  func.func @transform_5(%arg0: i32) -> (i32, i32) {
    %c0_i32 = arith.constant 0 : i32
    %c0_i32_0 = arith.constant 0 : i32
    return %arg0, %c0_i32 : i32, i32
  }
}

</mosaic_0001>

<bundles_post_ra>
// kernel: _mlp_pallas.1
= control target key start
LH: loop header
LB: loop body
LE: loop exit
PB: predicated region body
PF: predicated region fallthrough
CT: control target
= control target key end

     0   :  { %vm45_vm0 = vcmask 1045504   ;;  %v288_v6 = vmov 0.0   ;;  %vm41_vm1 = vcmask 179200   ;;  %s446_s0 = inlined_call_operand.vmem [shape: f32[2,22], index: 0, kind: input, shape index: {}]   ;;  %s447_s1 = inlined_call_operand.vmem [shape: f32[22,256], index: 1, kind: input, shape index: {}]   ;;  %s448_s2 = inlined_call_operand.vmem [shape: f32[1,256], index: 2, kind: input, shape index: {}]   ;;  %s449_s3 = inlined_call_operand.vmem [shape: f32[256,14], index: 3, kind: input, shape index: {}]   ;;  %s450_s4 = inlined_call_operand.vmem [shape: f32[1,14], index: 4, kind: input, shape index: {}]   ;;  %s451_s5 = inlined_call_operand.hbm [shape: f32[2,14], index: 5, kind: output, shape index: {}]  }
   0x1   :  { %v28_v0 = vld [vmem:[%s447_s1 + $0x28] sm:$0x3f]  ;;  %v27_v1 = vld [vmem:[%s447_s1 + $0x20] sm:$0x3f]  ;;  %v26_v2 = vld [vmem:[%s447_s1 + $0x18] sm:$0xff]  ;;  %116 = vmatprep.mubr.f32.mxu0 %v288_v6 }
   0x2   :  { %238 = vmatprep.subr.msk.mxu0 %vm45_vm0, %v28_v0  ;;  %v25_v3 = vld [vmem:[%s447_s1 + $0x10] sm:$0xff]  ;;  %v24_v4 = vld [vmem:[%s447_s1 + $0x8] sm:$0xff]  ;;  %v23_v5 = vld [vmem:[%s447_s1] sm:$0xff] }
   0x3   :  { %239 = vmatpush1.msk.msra.mxu0 %vm45_vm0, %v27_v1  ;;  %v22_v7 = vld [vmem:[%s446_s0] sm:$0x3]  ;;  %v157_v8 = vld [vmem:[%s449_s3 + $0xf0] sm:$0xff]  ;;  %v158_v9 = vld [vmem:[%s449_s3 + $0xf8] sm:$0xff] }
   0x4   :  { %80 = vmatprep.subr.mxu0 %v26_v2  ;;  %v174_v10 = vpack.c.bf16 %v158_v9, %v157_v8  ;;  %v141_v11 = vld [vmem:[%s449_s3 + $0x70] sm:$0xff]  ;;  %v142_v12 = vld [vmem:[%s449_s3 + $0x78] sm:$0xff]  ;;  %v155_v13 = vld [vmem:[%s449_s3 + $0xe0] sm:$0xff] }
   0x5   :  { %81 = vmatpush1.msra.mxu0 %v25_v3  ;;  %v166_v14 = vpack.c.bf16 %v142_v12, %v141_v11  ;;  %v156_v15 = vld [vmem:[%s449_s3 + $0xe8] sm:$0xff]  ;;  %v139_v16 = vld [vmem:[%s449_s3 + $0x60] sm:$0xff]  ;;  %v153_v19 = vld [vmem:[%s449_s3 + $0xd0] sm:$0xff] }
   0x6   :  { %v140_v17 = vld [vmem:[%s449_s3 + $0x68] sm:$0xff]  ;;  %82 = vmatprep.subr.mxu0 %v24_v4  ;;  %242 = vmatprep.subr.bf16.mxu1 %v174_v10  ;;  %v173_v18 = vpack.c.bf16 %v156_v15, %v155_v13  ;;  %v154_v20 = vld [vmem:[%s449_s3 + $0xd8] sm:$0xff]  ;;  %v137_v23 = vld [vmem:[%s449_s3 + $0x50] sm:$0xff] }
   0x7   :  { %83 = vmatpush1.msra.mxu0 %v23_v5  ;;  %243 = vmatpush3.bf16.msra.mxu1 %v166_v14  ;;  %v165_v21 = vpack.c.bf16 %v140_v17, %v139_v16  ;;  %v172_v22 = vpack.c.bf16 %v154_v20, %v153_v19  ;;  %v138_v24 = vld [vmem:[%s449_s3 + $0x58] sm:$0xff]  ;;  %v151_v25 = vld [vmem:[%s449_s3 + $0xc0] sm:$0xff]  ;;  %v152_v26 = vld [vmem:[%s449_s3 + $0xc8] sm:$0xff] }
   0x8   :  { %240 = vmatmul.mubr.msk.f32.vlgmr.msra.gmra.mxu0 %vm41_vm1, %v22_v7  ;;  %244 = vmatprep.subr.bf16.mxu1 %v173_v18  ;;  %v164_v27 = vpack.c.bf16 %v138_v24, %v137_v23 }
   0xb   :  { %245 = vmatpush3.bf16.msra.mxu1 %v165_v21 }
   0xc   :  { %10 = vsyncpa [#allocation3], 0  ;;  %246 = vmatprep.subr.bf16.mxu1 %v172_v22  ;;  %v171_v28 = vpack.c.bf16 %v152_v26, %v151_v25  ;;  %v135_v29 = vld [vmem:[%s449_s3 + $0x40] sm:$0xff]  ;;  %v136_v30 = vld [vmem:[%s449_s3 + $0x48] sm:$0xff]  ;;  %v31_v56 = vlaneseq  ;;  %vm222_vm2 = vcmask 107520  }
   0xd   :  { %v149_v31 = vld [vmem:[%s449_s3 + $0xb0] sm:$0xff]  ;;  %v150_v32 = vld [vmem:[%s449_s3 + $0xb8] sm:$0xff]  ;;  %v163_v33 = vpack.c.bf16 %v136_v30, %v135_v29  ;;  %v147_v37 = vld [vmem:[%s449_s3 + $0xa0] sm:$0xff] }
   0xe   :  { %v170_v34 = vpack.c.bf16 %v150_v32, %v149_v31  ;;  %v133_v35 = vld [vmem:[%s449_s3 + $0x30] sm:$0xff]  ;;  %v134_v36 = vld [vmem:[%s449_s3 + $0x38] sm:$0xff]  ;;  %v148_v38 = vld [vmem:[%s449_s3 + $0xa8] sm:$0xff]  ;;  %v32_v57 = vshrl.u32 %v31_v56, 7 }
   0xf   :  { %247 = vmatpush3.bf16.msra.mxu1 %v164_v27  ;;  %v162_v39 = vpack.c.bf16 %v134_v36, %v133_v35  ;;  %v169_v40 = vpack.c.bf16 %v148_v38, %v147_v37  ;;  %v131_v41 = vld [vmem:[%s449_s3 + $0x20] sm:$0xff]  ;;  %v132_v42 = vld [vmem:[%s449_s3 + $0x28] sm:$0xff]  ;;  %v145_v44 = vld [vmem:[%s449_s3 + $0x90] sm:$0xff] }
  0x10   :  { %248 = vmatprep.subr.bf16.mxu1 %v171_v28  ;;  %v161_v43 = vpack.c.bf16 %v132_v42, %v131_v41  ;;  %v146_v45 = vld [vmem:[%s449_s3 + $0x98] sm:$0xff]  ;;  %v129_v47 = vld [vmem:[%s449_s3 + $0x10] sm:$0xff]  ;;  %v143_v50 = vld [vmem:[%s449_s3 + $0x80] sm:$0xff]  ;;  %v33_v58 = vsub.s32 0, %v32_v57  ;;  %v37_v60 = vsub.s32 1, %v32_v57 }
  0x11   :  { %v168_v46 = vpack.c.bf16 %v146_v45, %v145_v44  ;;  %v130_v48 = vld [vmem:[%s449_s3 + $0x18] sm:$0xff]  ;;  %v144_v51 = vld [vmem:[%s449_s3 + $0x88] sm:$0xff]  ;;  %v127_v53 = vld [vmem:[%s449_s3] sm:$0xff] }
  0x12   :  { %v160_v49 = vpack.c.bf16 %v130_v48, %v129_v47  ;;  %v167_v52 = vpack.c.bf16 %v144_v51, %v143_v50  ;;  %v128_v54 = vld [vmem:[%s449_s3 + $0x8] sm:$0xff]  ;;  %v29_v59 = vld [vmem:[%s448_s2] sm:$0x3]  ;;  %s289_s2 = smov [#allocation2]  }
  0x13   :  { %249 = vmatpush3.bf16.msra.mxu1 %v163_v33  ;;  %v159_v55 = vpack.c.bf16 %v128_v54, %v127_v53  ;;  %v34_v61 = vrot.slane %v29_v59, %v33_v58  ;;  %v38_v62 = vrot.slane %v29_v59, %v37_v60  ;;  %v241_v8 = vld [vmem:[%s450_s4] ss:$0 sm:$0xff]  ;;  %s230_s18 = sshll.u32 %s289_s2, 4  ;;  %s231_s18 = int_to_ptr.vmem [resolvable:$true] %s230_s18 }
  0x14   :  { %250 = vmatprep.subr.bf16.mxu1 %v170_v34  ;;  %s266_s19 = scalar_lea.vmem %s231_s18, 32  ;;  %p271_p1 = scmp.lt.s32.totalorder %s231_s18, %s231_s18 }
  0x15   :  { %p267_p0 = scmp.ne.s32.totalorder %s231_s18, %s266_s19  ;;  %p272_p2 = scmp.lt.s32.totalorder %s266_s19, %s266_s19 }
  0x17   :  { %251 = vmatpush3.bf16.msra.mxu1 %v162_v39  ;;  %p273_p3 = por %p272_p2, %p271_p1 }
  0x18   :  { %252 = vmatprep.subr.bf16.mxu1 %v169_v40 }
  0x19   :  { %p274_p4 = pnand %p273_p3, %p267_p0 }
  0x1b   :  { %253 = vmatpush3.bf16.msra.mxu1 %v161_v43 }
  0x1c   :  { %254 = vmatprep.subr.bf16.mxu1 %v168_v46 }
  0x1f   :  { %255 = vmatpush3.bf16.msra.mxu1 %v160_v49 }
  0x20   :  { %256 = vmatprep.subr.bf16.mxu1 %v167_v52 }
  0x23   :  { %257 = vmatpush3.bf16.msra.mxu1 %v159_v55 }
  0xc8   :  { %v118_v63 = vpop.f32.mrf.mxu0 }
  0xc9   :  { %v119_v0 = vadd.f32 %v118_v63, %v34_v61 }
  0xca   :  { %v120_v1 = vpop.f32.mrf.mxu0 }
  0xcb   :  { %v121_v2 = vadd.f32 %v120_v1, %v38_v62  ;;  %v123_v3 = vmax.f32 %v119_v0, 0.0 }
  0xcd   :  { %v124_v4 = vmax.f32 %v121_v2, 0.0  ;;  %v125_v6 = vpack.c.bf16 %v123_v3, %v123_v3 }
  0xcf   :  { %v126_v5 = vpack.c.bf16 %v124_v4, %v124_v4 }
  0xd1   :  { %214 = vmatprep.mubr.bf16.mxu1 %v126_v5 }
  0xd2   :  { %215 = vmatmul.mubr.bf16.vlgmr.msra.gmra.mxu1 %v125_v6 }
 0x192   :  { %v258_v7 = vpop.f32.mrf.mxu1 }
 0x194   :  { %v259_v9 = vpop.f32.mrf.mxu1 }
 0x195   :  { %v260_v10 = vadd.f32 %v259_v9, %v258_v7 }
 0x196   :  { %v261_v11 = vpop.f32.mrf.mxu1 }
 0x197   :  { %v217_v12 = vadd.f32 %v260_v10, %v241_v8 }
 0x198   :  { %v262_v13 = vpop.f32.mrf.mxu1 }
 0x199   :  { %223 = vst.msk [vmem:[#allocation2] sm:$0x3] %vm222_vm2, %v217_v12 }
 0x19a   :  { %277 = shalt.err (!%p274_p4)
}
 0x19b   :  { %233 = dma.vmem_to_hbm [thread:$0]  %s231_s18, 32, %s451_s5, [#allocation3]  }
 0x19c   :  { %286 = dma.done.wait [#allocation3], 32  }
 0x19d   :  { %287 = vsyncadd [#allocation3], 4294967264 }
 0x19e   :  { %237 = vsyncpa [#allocation3], 1 }

</bundles_post_ra>
